<compile_context>
chip_gen: v7x
topology: tpu7x:2x2x1
jax: 0.10.0
libtpu: 0.0.40
codegen_flags: <defaults>
</compile_context>

<pallas_src>
import functools

import jax
import jax.numpy as jnp
from jax import lax
from jax.experimental import pallas as pl
from jax.experimental.pallas import tpu as pltpu

N_IDX = 215      # valid rows of ev_mat/dev_mat; idx is clamped to <= 214
MAT_ROWS = 256   # table rows padded to a multiple of 8 / power of two


def _round_up(x, m):
    return (x + m - 1) // m * m


def evdev_kernel(obs_ref, idx_ref, w_ref, b_ref, mat_ref, out_ref,
                 *, ev_rank, dev_rank, use_take):
    obs = obs_ref[...].astype(jnp.float32)                 # (Bb, F)  obs.float()
    bb = obs.shape[0]
    r_total = ev_rank + dev_rank

    # torch.clamp(idx, max=214); negative idx wrap-indexes like PyTorch.
    idx = jnp.minimum(idx_ref[...], N_IDX - 1)             # (Bb, 1) int32
    idx = jnp.where(idx < 0, idx + N_IDX, idx)
    idx = jnp.clip(idx, 0, MAT_ROWS - 1)                   # guards padded-block garbage

    # Fused linear layers (single MXU K pass for both heads).
    proj = jnp.dot(obs, w_ref[...],
                   preferred_element_type=jnp.float32) + b_ref[...]   # (Bb, R)

    # Row gather M[idx] where M = [ev_mat | dev_mat] (rows zero-padded to 256).
    if use_take:
        rows = jnp.take(mat_ref[...], idx[:, 0], axis=0)              # (Bb, R)
    else:
        # Fallback: fused one-hot MXU gather (exact: one-hot is 0/1).
        iota = lax.broadcasted_iota(jnp.int32, (bb, MAT_ROWS), 1)
        onehot = (iota == idx).astype(jnp.float32)                    # (Bb, 256)
        rows = jnp.dot(onehot, mat_ref[...],
                       preferred_element_type=jnp.float32)            # (Bb, R)

    prod = proj * rows                                                # (Bb, R)

    # Selector matmul: column 0 sums the ev ranks, column 1 the dev ranks.
    r_iota = lax.broadcasted_iota(jnp.int32, (r_total, 2), 0)
    c_iota = lax.broadcasted_iota(jnp.int32, (r_total, 2), 1)
    sel = ((r_iota >= ev_rank) == (c_iota == 1)).astype(jnp.float32)  # (R, 2)
    out_ref[...] = jnp.dot(prod, sel, preferred_element_type=jnp.float32)  # (Bb, 2)


def _build_call(B, F, r_total, ev_rank, dev_rank, block_b, use_take):
    kernel = functools.partial(evdev_kernel, ev_rank=ev_rank,
                               dev_rank=dev_rank, use_take=use_take)
    return pl.pallas_call(
        kernel,
        out_shape=jax.ShapeDtypeStruct((B, 2), jnp.float32),
        grid=(pl.cdiv(B, block_b),),
        in_specs=[
            pl.BlockSpec((block_b, F), lambda i: (i, 0)),        # obs (streamed)
            pl.BlockSpec((block_b, 1), lambda i: (i, 0)),        # idx (streamed)
            pl.BlockSpec((F, r_total), lambda i: (0, 0)),        # fused W (resident)
            pl.BlockSpec((1, r_total), lambda i: (0, 0)),        # fused bias (resident)
            pl.BlockSpec((MAT_ROWS, r_total), lambda i: (0, 0)), # fused ev/dev mat
        ],
        out_specs=pl.BlockSpec((block_b, 2), lambda i: (i, 0)),
        compiler_params=pltpu.CompilerParams(
            dimension_semantics=("parallel",)),
    )


def prepare_params(params):
    """One-time host-side fusion: hoists transposes/concats out of the call path."""
    ev_rank = params["ev_mat"].shape[1]
    dev_rank = params["dev_mat"].shape[1]
    w = jnp.concatenate([params["w_ev"].T, params["w_dev"].T], axis=1)   # (F, R)
    b = jnp.concatenate([params["b_ev"], params["b_dev"]]).reshape(1, -1)
    m = jnp.concatenate([params["ev_mat"], params["dev_mat"]], axis=1)   # (215, R)
    m = jnp.pad(m, ((0, MAT_ROWS - N_IDX), (0, 0)))                      # (256, R)
    return {"w": jnp.asarray(w, jnp.float32),
            "b": jnp.asarray(b, jnp.float32),
            "mat": jnp.asarray(m, jnp.float32),
            "ev_rank": ev_rank, "dev_rank": dev_rank}


def evdev_forward(prepared, obs, idx, *, block_b=1024):
    """Returns (2, B) float32, matching torch.stack([ev, dev])."""
    B, F = obs.shape
    r_total = prepared["ev_rank"] + prepared["dev_rank"]
    bb = min(block_b, _round_up(B, 8))     # block rows: multiple of 8, <= block_b
    obs = obs.astype(jnp.float32)
    idx2d = idx.astype(jnp.int32).reshape(B, 1)
    args = (obs, idx2d, prepared["w"], prepared["b"], prepared["mat"])

    try:
        out = _build_call(B, F, r_total, prepared["ev_rank"], prepared["dev_rank"],
                          bb, use_take=True)(*args)
        out = jax.block_until_ready(out)
    except Exception:
        # Dynamic row-gather did not lower on this Mosaic build -> one-hot gather.
        out = _build_call(B, F, r_total, prepared["ev_rank"], prepared["dev_rank"],
                          bb, use_take=False)(*args)
    return out.T                                   # (2, B)


def init_params(key, in_feat, ev_rank, dev_rank):
    """Synthetic init mimicking nn.Linear default (uniform +/- 1/sqrt(fan_in)).
    Uses the kR == 1 branch: ev_mat (215, ev_rank), dev_mat (215, dev_rank)."""
    ks = jax.random.split(key, 6)

    def unif(k, shape, fan_in):
        bound = 1.0 / jnp.sqrt(jnp.float32(fan_in))
        return jax.random.uniform(k, shape, jnp.float32, -bound, bound)

    return {
        "w_ev": unif(ks[0], (ev_rank, in_feat), in_feat),
        "b_ev": unif(ks[1], (ev_rank,), in_feat),
        "w_dev": unif(ks[2], (dev_rank, in_feat), in_feat),
        "b_dev": unif(ks[3], (dev_rank,), in_feat),
        "ev_mat": unif(ks[4], (N_IDX, ev_rank), ev_rank),
        "dev_mat": unif(ks[5], (N_IDX, dev_rank), dev_rank),
    }


def ref_forward(params, obs, idx):
    """Pure-JAX reference mirroring the PyTorch forward."""
    obs = obs.astype(jnp.float32)
    idx = jnp.minimum(idx, N_IDX - 1)
    ev_proj = obs @ params["w_ev"].T + params["b_ev"]
    dev_proj = obs @ params["w_dev"].T + params["b_dev"]
    ev = jnp.sum(ev_proj * params["ev_mat"][idx], axis=1)
    dev = jnp.sum(dev_proj * params["dev_mat"][idx], axis=1)
    return jnp.stack([ev, dev])


if __name__ == "__main__":
    B, in_feat, ev_rank, dev_rank = 8, 32, 16, 8

    key = jax.random.PRNGKey(0)
    kp, ko, ki = jax.random.split(key, 3)
    params = init_params(kp, in_feat, ev_rank, dev_rank)
    obs = jax.random.normal(ko, (B, in_feat), jnp.float32)
    # indices intentionally exceed 214 sometimes to exercise the clamp
    idx = jax.random.randint(ki, (B,), 0, 400, jnp.int32)

    prepared = prepare_params(params)
    out = evdev_forward(prepared, obs, idx)
    out = jax.block_until_ready(out)

    ref = ref_forward(params, obs, idx)
    assert out.shape == (2, B), out.shape
    assert jnp.allclose(out, ref, atol=1e-5, rtol=1e-5), (out, ref)
    print("KERNEL_OK")
</pallas_src>

<mosaic_0001>
module attributes {stable_mosaic.version = 11 : i64} {
  func.func @evdev_kernel(%arg0: i32, %arg1: memref<8x32xf32, #tpu.memory_space<vmem>>, %arg2: memref<8x1xi32, #tpu.memory_space<vmem>>, %arg3: memref<32x24xf32, #tpu.memory_space<vmem>>, %arg4: memref<1x24xf32, #tpu.memory_space<vmem>>, %arg5: memref<256x24xf32, #tpu.memory_space<vmem>>, %arg6: memref<8x2xf32, #tpu.memory_space<vmem>>) attributes {dimension_semantics = [#tpu.dimension_semantics<parallel>], iteration_bounds = array<i64: 1>, scalar_prefetch = 0 : i64, scratch_operands = 0 : i64, tpu.core_type = #tpu.core_type<tc>, window_params = [{transform_indices = @transform_0, window_bounds = array<i64: 8, 32>}, {transform_indices = @transform_1, window_bounds = array<i64: 8, 1>}, {pipeline_mode = #tpu.pipeline_mode<synchronous>, transform_indices = @transform_2, window_bounds = array<i64: 32, 24>}, {pipeline_mode = #tpu.pipeline_mode<synchronous>, transform_indices = @transform_3, window_bounds = array<i64: 1, 24>}, {pipeline_mode = #tpu.pipeline_mode<synchronous>, transform_indices = @transform_4, window_bounds = array<i64: 256, 24>}, {transform_indices = @transform_5, window_bounds = array<i64: 8, 2>}]} {
    %c0 = arith.constant 0 : index
    %c0_0 = arith.constant 0 : index
    %0 = vector.load %arg1[%c0, %c0_0] : memref<8x32xf32, #tpu.memory_space<vmem>>, vector<8x32xf32>
    %c0_1 = arith.constant 0 : index
    %c0_2 = arith.constant 0 : index
    %1 = vector.load %arg2[%c0_1, %c0_2] : memref<8x1xi32, #tpu.memory_space<vmem>>, vector<8x1xi32>
    %c214_i32 = arith.constant 214 : i32
    %2 = vector.broadcast %c214_i32 : i32 to vector<8x1xi32>
    %3 = arith.minsi %1, %2 : vector<8x1xi32>
    %c0_i32 = arith.constant 0 : i32
    %4 = vector.broadcast %c0_i32 : i32 to vector<8x1xi32>
    %5 = arith.cmpi slt, %3, %4 : vector<8x1xi32>
    %c215_i32 = arith.constant 215 : i32
    %6 = vector.broadcast %c215_i32 : i32 to vector<8x1xi32>
    %7 = arith.addi %3, %6 : vector<8x1xi32>
    %8 = arith.select %5, %7, %3 : vector<8x1xi1>, vector<8x1xi32>
    %c0_i32_3 = arith.constant 0 : i32
    %c255_i32 = arith.constant 255 : i32
    %9 = vector.broadcast %c0_i32_3 : i32 to vector<8x1xi32>
    %10 = arith.maxsi %9, %8 : vector<8x1xi32>
    %11 = vector.broadcast %c255_i32 : i32 to vector<8x1xi32>
    %12 = arith.minsi %11, %10 : vector<8x1xi32>
    %c0_4 = arith.constant 0 : index
    %c0_5 = arith.constant 0 : index
    %13 = vector.load %arg3[%c0_4, %c0_5] : memref<32x24xf32, #tpu.memory_space<vmem>>, vector<32x24xf32>
    %cst = arith.constant dense<0.000000e+00> : vector<8x24xf32>
    %14 = tpu.matmul %0, %13, %cst {dimension_numbers = #tpu.dot_dimension_numbers<[1], [0], [0], [1], [0, 0, 1, 1], [], []>} : vector<8x32xf32>, vector<32x24xf32>, vector<8x24xf32> -> vector<8x24xf32>
    %c0_6 = arith.constant 0 : index
    %c0_7 = arith.constant 0 : index
    %15 = vector.load %arg4[%c0_6, %c0_7] : memref<1x24xf32, #tpu.memory_space<vmem>>, vector<1x24xf32>
    %16 = vector.broadcast %15 : vector<1x24xf32> to vector<8x24xf32>
    %17 = arith.addf %14, %16 : vector<8x24xf32>
    %18 = tpu.iota {dimensions = array<i32: 1>} : vector<8x256xi32>
    %19 = vector.broadcast %12 : vector<8x1xi32> to vector<8x256xi32>
    %20 = arith.cmpi eq, %18, %19 : vector<8x256xi32>
    %21 = arith.extui %20 : vector<8x256xi1> to vector<8x256xi32>
    %22 = arith.sitofp %21 : vector<8x256xi32> to vector<8x256xf32>
    %c0_8 = arith.constant 0 : index
    %c0_9 = arith.constant 0 : index
    %23 = vector.load %arg5[%c0_8, %c0_9] : memref<256x24xf32, #tpu.memory_space<vmem>>, vector<256x24xf32>
    %cst_10 = arith.constant dense<0.000000e+00> : vector<8x24xf32>
    %24 = tpu.matmul %22, %23, %cst_10 {dimension_numbers = #tpu.dot_dimension_numbers<[1], [0], [0], [1], [0, 0, 1, 1], [], []>} : vector<8x256xf32>, vector<256x24xf32>, vector<8x24xf32> -> vector<8x24xf32>
    %25 = arith.mulf %17, %24 : vector<8x24xf32>
    %26 = tpu.iota {dimensions = array<i32: 0>} : vector<24x2xi32>
    %27 = tpu.iota {dimensions = array<i32: 1>} : vector<24x2xi32>
    %c16_i32 = arith.constant 16 : i32
    %28 = vector.broadcast %c16_i32 : i32 to vector<24x2xi32>
    %29 = arith.cmpi sge, %26, %28 : vector<24x2xi32>
    %c1_i32 = arith.constant 1 : i32
    %30 = vector.broadcast %c1_i32 : i32 to vector<24x2xi32>
    %31 = arith.cmpi eq, %27, %30 : vector<24x2xi32>
    %32 = arith.xori %29, %31 : vector<24x2xi1>
    %cst_11 = arith.constant dense<true> : vector<24x2xi1>
    %33 = arith.xori %32, %cst_11 : vector<24x2xi1>
    %34 = arith.extui %33 : vector<24x2xi1> to vector<24x2xi32>
    %35 = arith.sitofp %34 : vector<24x2xi32> to vector<24x2xf32>
    %cst_12 = arith.constant dense<0.000000e+00> : vector<8x2xf32>
    %36 = tpu.matmul %25, %35, %cst_12 {dimension_numbers = #tpu.dot_dimension_numbers<[1], [0], [0], [1], [0, 0, 1, 1], [], []>} : vector<8x24xf32>, vector<24x2xf32>, vector<8x2xf32> -> vector<8x2xf32>
    %c0_13 = arith.constant 0 : index
    %c0_14 = arith.constant 0 : index
    %37 = vector.load %arg6[%c0_13, %c0_14] : memref<8x2xf32, #tpu.memory_space<vmem>>, vector<8x2xf32>
    tpu.vector_store %arg6[%c0_13, %c0_14], %36 {strides = array<i32>} : memref<8x2xf32, #tpu.memory_space<vmem>>, vector<8x2xf32>,
    return
  }
  func.func @transform_0(%arg0: i32) -> (i32, i32) {
    %c0_i32 = arith.constant 0 : i32
    %c0_i32_0 = arith.constant 0 : i32
    return %arg0, %c0_i32 : i32, i32
  }
  func.func @transform_1(%arg0: i32) -> (i32, i32) {
    %c0_i32 = arith.constant 0 : i32
    %c0_i32_0 = arith.constant 0 : i32
    return %arg0, %c0_i32 : i32, i32
  }
  func.func @transform_2(%arg0: i32) -> (i32, i32) {
    %c0_i32 = arith.constant 0 : i32
    %c0_i32_0 = arith.constant 0 : i32
    %c0_i32_1 = arith.constant 0 : i32
    return %c0_i32, %c0_i32_0 : i32, i32
  }
  func.func @transform_3(%arg0: i32) -> (i32, i32) {
    %c0_i32 = arith.constant 0 : i32
    %c0_i32_0 = arith.constant 0 : i32
    %c0_i32_1 = arith.constant 0 : i32
    return %c0_i32, %c0_i32_0 : i32, i32
  }
  func.func @transform_4(%arg0: i32) -> (i32, i32) {
    %c0_i32 = arith.constant 0 : i32
    %c0_i32_0 = arith.constant 0 : i32
    %c0_i32_1 = arith.constant 0 : i32
    return %c0_i32, %c0_i32_0 : i32, i32
  }
  func.func @transform_5(%arg0: i32) -> (i32, i32) {
    %c0_i32 = arith.constant 0 : i32
    %c0_i32_0 = arith.constant 0 : i32
    return %arg0, %c0_i32 : i32, i32
  }
}

</mosaic_0001>

<bundles_post_ra>
// kernel: tpu_custom_call.1
= control target key start
LH: loop header
LB: loop body
LE: loop exit
PB: predicated region body
PF: predicated region fallthrough
CT: control target
= control target key end

     0   :  { %v457_v0 = vmov 0   ;;  %v458_v4 = vmov 0.0|0.0   ;;  %vm459_vm4 = vmmov 0   ;;  %v460_v38 = vmov 0.0   ;;  %s619_s1 = inlined_call_operand.vmem [shape: s32[8,1], index: 1, kind: input, shape index: {}]   ;;  %s620_s4 = inlined_call_operand.vmem [shape: f32[256,24], index: 4, kind: input, shape index: {}]   ;;  %s621_s2 = inlined_call_operand.vmem [shape: f32[32,24], index: 2, kind: input, shape index: {}]   ;;  %s622_s0 = inlined_call_operand.vmem [shape: f32[8,32], index: 0, kind: input, shape index: {}]   ;;  %s623_s3 = inlined_call_operand.vmem [shape: f32[1,24], index: 3, kind: input, shape index: {}]   ;;  %s624_s5 = inlined_call_operand.vmem [shape: f32[8,2], index: 5, kind: output, shape index: {}]  }
   0x1   :  { %456 = vset.pattern.permute.xlu0 %v457_v0  ;;  %v21_v1 = vld [vmem:[%s619_s1] sm:$0xff]  ;;  %v145_v3 = vld [vmem:[%s620_s4 + $0x88] sm:$0xff]  ;;  %408 = vmatprep.subr.bf16.mxu0 %v458_v4  ;;  %v146_v8 = vld [vmem:[%s620_s4 + $0x90] sm:$0xff]  ;;  %vm42_vm5 = vcmask 261120   ;;  %v116_v0 = vlaneseq  ;;  %vm462_vm9 = vmmov 1   ;;  %vm251_vm14 = vcmask 195584  }
   0x2   :  { %v144_v2 = vld [vmem:[%s620_s4 + $0x80] sm:$0xff]  ;;  %vm22_vm0 = vcmp.lt.s32.totalorder %v21_v1, 214  ;;  %v129_v7 = vld [vmem:[%s620_s4 + $0x8] sm:$0xff]  ;;  %v147_v11 = vld [vmem:[%s620_s4 + $0x98] sm:$0xff]  ;;  %396 = vmatprep.mubr.msk.f32.mxu0 %vm459_vm4, %v460_v38  ;;  %vm325_vm15 = vcmask 15360  }
   0x3   :  { %v414_v5 = vpack.c.bf16 %v145_v3, %v144_v2  ;;  %v128_v6 = vld [vmem:[%s620_s4] sm:$0xff]  ;;  %v23_v9 = vsel %vm22_vm0, %v21_v1, 214  ;;  %v130_v12 = vld [vmem:[%s620_s4 + $0x10] sm:$0xff]  ;;  %v131_v13 = vld [vmem:[%s620_s4 + $0x18] sm:$0xff]  ;;  %v418_v15 = vpack.c.bf16 %v147_v11, %v146_v8  ;;  %v117_v1 = vand.u32 127, %v116_v0 }
   0x4   :  { %v416_v10 = vpack.c.bf16 %v129_v7, %v128_v6  ;;  %vm24_vm1 = vcmp.lt.s32.totalorder %v23_v9, 0  ;;  %v25_v14 = vadd.s32 215, %v23_v9  ;;  %v148_v16 = vld [vmem:[%s620_s4 + $0xa0] sm:$0xff]  ;;  %v149_v17 = vld [vmem:[%s620_s4 + $0xa8] sm:$0xff]  ;;  %v420_v18 = vpack.c.bf16 %v131_v13, %v130_v12  ;;  %v150_v23 = vld [vmem:[%s620_s4 + $0xb0] sm:$0xff] }
   0x5   :  { %415 = vmatprep.subr.bf16.mxu1 %v414_v5  ;;  %v422_v20 = vpack.c.bf16 %v149_v17, %v148_v16  ;;  %v132_v21 = vld [vmem:[%s620_s4 + $0x20] sm:$0xff]  ;;  %v133_v22 = vld [vmem:[%s620_s4 + $0x28] sm:$0xff]  ;;  %v151_v24 = vld [vmem:[%s620_s4 + $0xb8] sm:$0xff]  ;;  %v118_v2 = vadd.s32 128, %v117_v1  ;;  %vm238_vm8 = vcmp.eq.s32.totalorder %v117_v1, 1 }
   0x6   :  { %417 = vmatpush3.bf16.msra.mxu1 %v416_v10  ;;  %v26_v19 = vsel %vm24_vm1, %v25_v14, %v23_v9  ;;  %v424_v26 = vpack.c.bf16 %v133_v22, %v132_v21  ;;  %v134_v27 = vld [vmem:[%s620_s4 + $0x30] sm:$0xff]  ;;  %v426_v29 = vpack.c.bf16 %v151_v24, %v150_v23  ;;  %v135_v30 = vld [vmem:[%s620_s4 + $0x38] sm:$0xff]  ;;  %v31_v31 = vld [vmem:[%s621_s2] sm:$0xff]  ;;  %v463_v5 = vmov 1.0|1.0  }
   0x7   :  { %419 = vmatprep.subr.bf16.mxu1 %v418_v15  ;;  %vm27_vm2 = vcmp.gt.s32.totalorder %v26_v19, 0  ;;  %v32_v32 = vld [vmem:[%s621_s2 + $0x8] sm:$0xff]  ;;  %v152_v33 = vld [vmem:[%s620_s4 + $0xc0] sm:$0xff]  ;;  %v33_v36 = vld [vmem:[%s621_s2 + $0x10] sm:$0xff]  ;;  %v428_v39 = vpack.c.bf16 %v135_v30, %v134_v27 }
   0x8   :  { %v28_v25 = vsel %vm27_vm2, %v26_v19, 0  ;;  %v153_v34 = vld [vmem:[%s620_s4 + $0xc8] sm:$0xff]  ;;  %v409_v35 = vpack.c.bf16 %v32_v32, %v31_v31  ;;  %v34_v37 = vld [vmem:[%s621_s2 + $0x18] sm:$0xff]  ;;  %v136_v42 = vld [vmem:[%s620_s4 + $0x40] sm:$0xff] }
   0x9   :  { %vm29_vm3 = vcmp.lt.s32.totalorder %v28_v25, 255  ;;  %v412_v40 = vpack.c.bf16 %v34_v37, %v33_v36  ;;  %v430_v41 = vpack.c.bf16 %v153_v34, %v152_v33  ;;  %v137_v43 = vld [vmem:[%s620_s4 + $0x48] sm:$0xff]  ;;  %v154_v44 = vld [vmem:[%s620_s4 + $0xd0] sm:$0xff]  ;;  %v155_v45 = vld [vmem:[%s620_s4 + $0xd8] sm:$0xff] }
   0xa   :  { %421 = vmatpush3.bf16.msra.mxu1 %v420_v18  ;;  %v30_v28 = vsel %vm29_vm3, %v28_v25, 255  ;;  %410 = vmatpush3.bf16.msra.mxu0 %v409_v35  ;;  %v432_v46 = vpack.c.bf16 %v137_v43, %v136_v42  ;;  %v20_v47 = vld [vmem:[%s622_s0] sm:$0xff]  ;;  %v434_v48 = vpack.c.bf16 %v155_v45, %v154_v44  ;;  %v138_v49 = vld [vmem:[%s620_s4 + $0x50] sm:$0xff]  ;;  %v139_v50 = vld [vmem:[%s620_s4 + $0x58] sm:$0xff] }
   0xb   :  { %423 = vmatprep.subr.bf16.mxu1 %v422_v20  ;;  %120 = vperm.xlu0 %456, %v30_v28   ;;  %v156_v51 = vld [vmem:[%s620_s4 + $0xe0] sm:$0xff]  ;;  %v157_v52 = vld [vmem:[%s620_s4 + $0xe8] sm:$0xff]  ;;  %v436_v53 = vpack.c.bf16 %v139_v50, %v138_v49  ;;  %v158_v57 = vld [vmem:[%s620_s4 + $0xf0] sm:$0xff] }
   0xc   :  { %411 = vmatprep.subr.bf16.mxu0 %v458_v4  ;;  %v438_v54 = vpack.c.bf16 %v157_v52, %v156_v51  ;;  %v140_v55 = vld [vmem:[%s620_s4 + $0x60] sm:$0xff]  ;;  %v141_v56 = vld [vmem:[%s620_s4 + $0x68] sm:$0xff]  ;;  %v159_v58 = vld [vmem:[%s620_s4 + $0xf8] sm:$0xff] }
   0xd   :  { %v440_v59 = vpack.c.bf16 %v141_v56, %v140_v55  ;;  %v442_v60 = vpack.c.bf16 %v159_v58, %v158_v57  ;;  %v142_v61 = vld [vmem:[%s620_s4 + $0x70] sm:$0xff]  ;;  %v143_v62 = vld [vmem:[%s620_s4 + $0x78] sm:$0xff]  ;;  %vm242_vm10 = vmxor %vm238_vm8, %vm462_vm9 }
   0xe   :  { %425 = vmatpush3.bf16.msra.mxu1 %v424_v26  ;;  %413 = vmatpush3.bf16.msra.mxu0 %v412_v40  ;;  %v444_v63 = vpack.c.bf16 %v143_v62, %v142_v61  ;;  %vm447_vm11 = vmpackc.low %vm242_vm10, %vm242_vm10  ;;  %v331_v8 = vld [vmem:[%s623_s3] ss:$0 sm:$0xff] }
   0xf   :  { %427 = vmatprep.subr.bf16.mxu1 %v426_v29  ;;  %446 = vmatprep.subr.bf16.mxu0 %v458_v4  ;;  %v461_v4 = vmov 1.0   ;;  %vm241_vm12 = vmxor %vm462_vm9, %vm238_vm8 }
  0x10   :  { %vm244_vm13 = vmxor %vm241_vm12, %vm462_vm9 }
  0x11   :  { %397 = vmatmul.mubr.msk.f32.vlgmr.msra.gmra.mrb[0].mxu0 %vm42_vm5, %v20_v47 }
  0x12   :  { %429 = vmatpush3.bf16.msra.mxu1 %v428_v39  ;;  %405 = vmatprep.mubr.msk.f32.mxu0 %vm459_vm4, %v460_v38 }
  0x13   :  { %431 = vmatprep.subr.bf16.mxu1 %v430_v41  ;;  %448 = vmatpush3.bf16.msk.msra.mxu0 %vm447_vm11, %v463_v5 }
  0x14   :  { %403 = vmatprep.subr.mxu0 %v460_v38 }
  0x16   :  { %433 = vmatpush3.bf16.msra.mxu1 %v432_v46 }
  0x17   :  { %435 = vmatprep.subr.bf16.mxu1 %v434_v48  ;;  %404 = vmatpush3.msk.msra.mxu0 %vm244_vm13, %v461_v4 }
  0x1a   :  { %437 = vmatpush3.bf16.msra.mxu1 %v436_v53 }
  0x1b   :  { %439 = vmatprep.subr.bf16.mxu1 %v438_v54 }
  0x1e   :  { %441 = vmatpush3.bf16.msra.mxu1 %v440_v59 }
  0x1f   :  { %443 = vmatprep.subr.bf16.mxu1 %v442_v60 }
  0x22   :  { %445 = vmatpush3.bf16.msra.mxu1 %v444_v63 }
  0x8a   :  { %v121_v3 = vpop.permute.xlu0 %120 }
  0x8b   :  { %vm122_vm6 = vcmp.eq.s32.totalorder %v117_v1, %v121_v3  ;;  %vm123_vm7 = vcmp.eq.s32.totalorder %v118_v2, %v121_v3 }
  0x8c   :  { %335 = vmatprep.mubr.msk.f32.mxu1 %vm123_vm7, %v461_v4 }
  0x8d   :  { %336 = vmatmul.mubr.msk.f32.vlgmr.msra.gmra.mrb[0].mxu1 %vm122_vm6, %v461_v4 }
  0xe4   :  { %v112_v6 = vpop.f32.mrb[0].mxu0 }
  0xe5   :  { %v398_v7 = vpop.f32.mrb[1].mxu0  ;;  %v113_v9 = vadd.f32 %v331_v8, %v112_v6 }
 0x160   :  { %v381_v10 = vpop.f32.mrb[0].mxu1 }
 0x161   :  { %v382_v11 = vpop.f32.mrb[1].mxu1 }
 0x162   :  { %v383_v12 = vadd.f32 %v382_v11, %v381_v10 }
 0x164   :  { %v230_v13 = vmul.f32 %v383_v12, %v113_v9 }
 0x166   :  { %406 = vmatmul.mubr.msk.f32.vlgmr.msra.gmra.mrb[2].mxu0 %vm251_vm14, %v230_v13 }
 0x239   :  { %v321_v14 = vpop.f32.mrb[2].mxu0 }
 0x23a   :  { %326 = vst.msk [vmem:[%s624_s5] sm:$0xff] %vm325_vm15, %v321_v14  ;;  %v407_v15 = vpop.f32.mrb[3].mxu0 }

</bundles_post_ra>
